<compile_context>
chip_gen: v7x
topology: tpu7x:2x2x1
jax: 0.10.0
libtpu: 0.0.40
codegen_flags: <defaults>
</compile_context>

<pallas_src>
import jax
import jax.numpy as jnp
from jax import lax
from jax.experimental import pallas as pl
from jax.experimental.pallas import tpu as pltpu

_LANE = 128   # TPU vreg lane width; lane-dense output tile multiple
_NROWS = 8    # sublane-aligned row count for the packed projection weights


def token_proj_kernel(x_ref, w_ref, out_ref):
    """x_ref: (1, TILE_S, H) token slab; w_ref: (_NROWS, H) folded projection
    vectors (row 0 = start path, row 1 = end path, rows 2..7 zero padding);
    out_ref: (1, _NROWS, TILE_S) lane-dense per-token contributions."""
    x = x_ref[0]          # (TILE_S, H)
    w = w_ref[...]        # (_NROWS, H)
    # Single MXU contraction (rhs-transposed matmul), f32 accumulation.
    # Produces the output directly in lane-dense (_NROWS, TILE_S) layout:
    # unmasked stores, no concat shuffle, no (TILE_S, H) elementwise temps.
    out_ref[0] = lax.dot_general(
        w, x, dimension_numbers=(((1,), (1,)), ((), ())),
        preferred_element_type=jnp.float32)


def _pick_tile_s(S, H, B, itemsize):
    """Largest multiple of 128 whose double-buffered input stays ~12 MiB."""
    budget_per_buf = 6 * 1024 * 1024
    t = (budget_per_buf // max(H * itemsize, 1)) // _LANE * _LANE
    t = max(_LANE, min(t, 2048))
    s_min = pl.cdiv(S, _LANE) * _LANE
    t = min(t, s_min)
    # When B == 1, make sure the parallel S axis has >= 2 steps so v7x's
    # second TensorCore gets work (no-op when S fits in a single lane tile).
    if B == 1 and s_min > _LANE and s_min <= t:
        t = max(_LANE, ((s_min // 2) // _LANE) * _LANE)
    return t


def mention_scorer_forward(sequence_output, span_starts, span_ends, params,
                           max_span_width, input_dtype=jnp.float32):
    """sequence_output: (B, S, H) f32; span_starts/ends: (B, N) int32.
    Returns scores: (B, N) f32."""
    B, S, H = sequence_output.shape

    # ---- fold the linear chain in the wrapper (tiny weights, f32 math) ----
    wm = params["scorer_w"].T                      # (H, 1)
    woT = params["output_w"].T                     # (2H+Dw, H)
    u_s = woT[:H] @ wm                             # (H, 1)
    u_e = woT[H:2 * H] @ wm                        # (H, 1)
    u_w = woT[2 * H:] @ wm                         # (Dw, 1)
    v_s = params["ff_start_w"].T @ u_s             # (H, 1)
    v_e = params["ff_end_w"].T @ u_e               # (H, 1)
    bias_scalar = (params["ff_start_b"] @ u_s
                   + params["ff_end_b"] @ u_e
                   + params["output_b"] @ wm
                   + params["scorer_b"])[0]        # scalar
    width_score = (params["width_table"] @ u_w)[:, 0]   # (max_span_width+1,)
    w2 = jnp.concatenate([v_s.T, v_e.T], axis=0)        # (2, H)
    w_packed = jnp.zeros((_NROWS, H), jnp.float32).at[:2, :].set(w2)

    # ---- tile selection (VMEM-budget-driven, lane-dense output) ----
    itemsize = jnp.dtype(input_dtype).itemsize
    TILE_S = _pick_tile_s(S, H, B, itemsize)
    S_pad = pl.cdiv(S, TILE_S) * TILE_S

    seq = sequence_output
    if S_pad != S:
        seq = jnp.pad(seq, ((0, 0), (0, S_pad - S), (0, 0)))
    if seq.dtype != input_dtype:
        seq = seq.astype(input_dtype)
    w_packed = w_packed.astype(input_dtype)

    # vmem limit derived from actual double-buffered tile footprint + margin.
    in_block = TILE_S * H * itemsize
    out_block = _NROWS * TILE_S * 4
    w_bytes = _NROWS * H * itemsize
    vmem_limit = min(int(2 * (in_block + out_block + w_bytes)
                         + 4 * 1024 * 1024), 64 * 1024 * 1024)

    cost = pl.CostEstimate(
        flops=int(2 * B * S_pad * _NROWS * H),
        transcendentals=0,
        bytes_accessed=int(B * S_pad * H * itemsize
                           + 4 * B * _NROWS * S_pad
                           + _NROWS * H * itemsize),
    )

    proj = pl.pallas_call(
        token_proj_kernel,
        out_shape=jax.ShapeDtypeStruct((B, _NROWS, S_pad), jnp.float32),
        grid_spec=pltpu.PrefetchScalarGridSpec(
            num_scalar_prefetch=0,
            grid=(B, S_pad // TILE_S),
            in_specs=[
                pl.BlockSpec((1, TILE_S, H), lambda b, s: (b, s, 0)),   # tokens
                pl.BlockSpec((_NROWS, H), lambda b, s: (0, 0)),         # weights
            ],
            out_specs=pl.BlockSpec((1, _NROWS, TILE_S), lambda b, s: (b, 0, s)),
        ),
        compiler_params=pltpu.CompilerParams(
            dimension_semantics=("parallel", "parallel"),
            vmem_limit_bytes=vmem_limit,
        ),
        cost_estimate=cost,
    )(seq, w_packed)

    # ---- per-span scalar gathers (pure indexing glue, tiny traffic) ----
    # TODO(synk): could be fused via num_scalar_prefetch=2 (SMEM span tables);
    # low priority since saved bytes are ~2/H of the input stream.
    # NOTE: relies on XLA gather clamping for out-of-range indices (PyTorch
    # would raise); padded rows beyond S are computed but never gathered.
    widths = jnp.clip(span_ends - span_starts, 0, max_span_width)   # (B, N)
    p_start = jnp.take_along_axis(proj[:, 0, :], span_starts, axis=1)
    p_end = jnp.take_along_axis(proj[:, 1, :], span_ends, axis=1)
    scores = p_start + p_end + width_score[widths] + bias_scalar
    return scores  # (B, N)


def init_params(key, hidden_size, max_span_width, width_embedding_dim=30):
    H, Dw = hidden_size, width_embedding_dim
    ks = jax.random.split(key, 9)
    scale = 0.02
    return {
        # nn.Linear stores weight as (out_features, in_features)
        "ff_start_w": scale * jax.random.normal(ks[0], (H, H), jnp.float32),
        "ff_start_b": scale * jax.random.normal(ks[1], (H,), jnp.float32),
        "ff_end_w":   scale * jax.random.normal(ks[2], (H, H), jnp.float32),
        "ff_end_b":   scale * jax.random.normal(ks[3], (H,), jnp.float32),
        "width_table": scale * jax.random.normal(
            ks[4], (max_span_width + 1, Dw), jnp.float32),
        "output_w": scale * jax.random.normal(ks[5], (H, 2 * H + Dw), jnp.float32),
        "output_b": scale * jax.random.normal(ks[6], (H,), jnp.float32),
        "scorer_w": scale * jax.random.normal(ks[7], (1, H), jnp.float32),
        "scorer_b": scale * jax.random.normal(ks[8], (1,), jnp.float32),
    }


def reference_forward(sequence_output, span_starts, span_ends, params,
                      max_span_width):
    """Pure-JAX reference mirroring the PyTorch forward (un-folded)."""
    B, S, H = sequence_output.shape
    batch_idx = jnp.arange(B)[:, None]
    st = sequence_output[batch_idx, span_starts]
    en = sequence_output[batch_idx, span_ends]
    s_emb = st @ params["ff_start_w"].T + params["ff_start_b"]
    e_emb = en @ params["ff_end_w"].T + params["ff_end_b"]
    widths = jnp.clip(span_ends - span_starts, 0, max_span_width)
    w_emb = params["width_table"][widths]
    span_embedding = jnp.concatenate([s_emb, e_emb, w_emb], axis=-1)
    span_repr = span_embedding @ params["output_w"].T + params["output_b"]
    scores = (span_repr @ params["scorer_w"].T + params["scorer_b"])[..., 0]
    return scores


if __name__ == "__main__":
    B, S, H, N = 2, 16, 32, 8
    MAX_SPAN_WIDTH = 10

    key = jax.random.PRNGKey(0)
    k_seq, k_st, k_w, k_p = jax.random.split(key, 4)

    sequence_output = jax.random.normal(k_seq, (B, S, H), jnp.float32)
    span_starts = jax.random.randint(k_st, (B, N), 0, S, dtype=jnp.int32)
    span_lens = jax.random.randint(k_w, (B, N), 0, MAX_SPAN_WIDTH + 3,
                                   dtype=jnp.int32)
    span_ends = jnp.clip(span_starts + span_lens, 0, S - 1).astype(jnp.int32)

    params = init_params(k_p, H, MAX_SPAN_WIDTH)

    scores = mention_scorer_forward(sequence_output, span_starts, span_ends,
                                    params, MAX_SPAN_WIDTH)
    jax.block_until_ready(scores)

    ref = reference_forward(sequence_output, span_starts, span_ends,
                            params, MAX_SPAN_WIDTH)
    assert scores.shape == (B, N)
    assert jnp.allclose(scores, ref, atol=1e-4, rtol=1e-4), (
        f"max err {jnp.max(jnp.abs(scores - ref))}")

    print("KERNEL_OK")
</pallas_src>

<mosaic_0001>
module attributes {stable_mosaic.version = 11 : i64} {
  func.func @token_proj_kernel(%arg0: i32, %arg1: i32, %arg2: memref<1x128x32xf32, #tpu.memory_space<vmem>>, %arg3: memref<8x32xf32, #tpu.memory_space<vmem>>, %arg4: memref<1x8x128xf32, #tpu.memory_space<vmem>>) attributes {dimension_semantics = [#tpu.dimension_semantics<parallel>, #tpu.dimension_semantics<parallel>], iteration_bounds = array<i64: 2, 1>, scalar_prefetch = 0 : i64, scratch_operands = 0 : i64, tpu.core_type = #tpu.core_type<tc>, window_params = [{transform_indices = @transform_0, window_bounds = array<i64: 1, 128, 32>}, {pipeline_mode = #tpu.pipeline_mode<synchronous>, transform_indices = @transform_1, window_bounds = array<i64: 8, 32>}, {transform_indices = @transform_2, window_bounds = array<i64: 1, 8, 128>}]} {
    %c0 = arith.constant 0 : index
    %c0_0 = arith.constant 0 : index
    %c0_1 = arith.constant 0 : index
    %0 = vector.load %arg2[%c0, %c0_0, %c0_1] : memref<1x128x32xf32, #tpu.memory_space<vmem>>, vector<1x128x32xf32>
    %1 = vector.shape_cast %0 : vector<1x128x32xf32> to vector<128x32xf32>
    %c0_2 = arith.constant 0 : index
    %c0_3 = arith.constant 0 : index
    %2 = vector.load %arg3[%c0_2, %c0_3] : memref<8x32xf32, #tpu.memory_space<vmem>>, vector<8x32xf32>
    %cst = arith.constant dense<0.000000e+00> : vector<8x128xf32>
    %3 = tpu.matmul %2, %1, %cst {dimension_numbers = #tpu.dot_dimension_numbers<[1], [1], [0], [0], [0, 0, 1, 0], [], []>} : vector<8x32xf32>, vector<128x32xf32>, vector<8x128xf32> -> vector<8x128xf32>
    %c0_4 = arith.constant 0 : index
    %c0_5 = arith.constant 0 : index
    %c0_6 = arith.constant 0 : index
    %4 = vector.load %arg4[%c0_4, %c0_5, %c0_6] : memref<1x8x128xf32, #tpu.memory_space<vmem>>, vector<1x8x128xf32>
    %5 = vector.shape_cast %4 : vector<1x8x128xf32> to vector<8x128xf32>
    %6 = vector.shape_cast %3 : vector<8x128xf32> to vector<1x8x128xf32>
    tpu.vector_store %arg4[%c0_4, %c0_5, %c0_6], %6 {strides = array<i32>} : memref<1x8x128xf32, #tpu.memory_space<vmem>>, vector<1x8x128xf32>,
    return
  }
  func.func @transform_0(%arg0: i32, %arg1: i32) -> (i32, i32, i32) {
    %c0_i32 = arith.constant 0 : i32
    %c0_i32_0 = arith.constant 0 : i32
    return %arg0, %arg1, %c0_i32 : i32, i32, i32
  }
  func.func @transform_1(%arg0: i32, %arg1: i32) -> (i32, i32) {
    %c0_i32 = arith.constant 0 : i32
    %c0_i32_0 = arith.constant 0 : i32
    %c0_i32_1 = arith.constant 0 : i32
    return %c0_i32, %c0_i32_0 : i32, i32
  }
  func.func @transform_2(%arg0: i32, %arg1: i32) -> (i32, i32, i32) {
    %c0_i32 = arith.constant 0 : i32
    %c0_i32_0 = arith.constant 0 : i32
    return %arg0, %c0_i32, %arg1 : i32, i32, i32
  }
}

</mosaic_0001>

<bundles_post_ra>
// kernel: tpu_custom_call.1
= control target key start
LH: loop header
LB: loop body
LE: loop exit
PB: predicated region body
PF: predicated region fallthrough
CT: control target
= control target key end

     0   :  { %7 = vsyncpa [#allocation3], 0  ;;  %s828_s0 = inlined_call_operand.vmem [shape: f32[2,128,32], index: 0, kind: input, shape index: {}]   ;;  %s829_s1 = inlined_call_operand.vmem [shape: f32[8,32], index: 1, kind: input, shape index: {}]   ;;  %s830_s2 = inlined_call_operand.hbm [shape: f32[2,8,128], index: 2, kind: output, shape index: {}]  }
   0x1   :  { %9 = vsyncpa [#allocation3 + $0x1], 0  ;;  %s672_s9 = smov 0   ;;  %s674_s10 = smov 0  }
   0x2   :  { %s676_s11 = smov 0   ;;  %s678_s12 = smov 0  }
   0x3   :  { %s680_s13 = smov 0   ;;  %s682_s14 = smov 0  }
   0x4 LB: > { %s401_s15 = sadd.s32 4294967295, %s651_s14   ;;  %s402_s16 = sadd.s32 4294967294, %s651_s14   ;;  %s651_s14 = sphi %s682_s14, %s15_s14   ;;  %s647_s13 = sphi %s680_s13, %s839_s13   ;;  %s643_s12 = sphi %s678_s12, %s838_s12   ;;  %s639_s11 = sphi %s676_s11, %s837_s11   ;;  %s635_s10 = sphi %s674_s10, %s836_s10   ;;  %s631_s9 = sphi %s672_s9, %s835_s9  }
   0x5   : > { %s27_s17 = sadd.s32 1, %s647_s13  ;;  %s85_s18 = sadd.s32 1, %s639_s11 }
   0x6   : > { %p29_p0 = scmp.ge.s32.totalorder %s27_s17, 2  ;;  %p95_p1 = scmp.ne.s32.totalorder %s639_s11, %s635_s10 }
   0x7   : > { %p96_p2 = scmp.eq.s32.totalorder %s401_s15, 1  ;;  %p101_p3 = scmp.ne.s32.totalorder %s635_s10, %s631_s9 }
   0x8   : > { %s841_s17 = smov (%p29_p0, %s27_s17), 0  ;;  %p102_p5 = scmp.eq.s32.totalorder %s402_s16, 1 }
   0x9   : > { %p712_p4 = por %p96_p2, %p95_p1  ;;  %s80_s20 = ssub.s32 %s647_s13, %s841_s17 }
   0xa   : > { %p405_p6 = scmp.ge.s32.totalorder %s651_s14, 1  ;;  %p83_p7 = scmp.eq.s32.totalorder %s80_s20, 0 }
   0xb   : > { %p719_p8 = por %p102_p5, %p101_p3  ;;  %p136_p9 = scmp.lt.s32.totalorder %s651_s14, 3 }
   0xc   : > { %s725_s22 = scalar_select %p83_p7, %s639_s11, %s85_s18  }
   0xd   : > { %p137_p10 = pnand %p405_p6, %p136_p9 }
   0xe   : > { %p163_p11 = scmp.lt.s32.totalorder (!%p137_p10), %s643_s12, 1  ;;  %v653_v0 = vmov (!%p137_p10), 0.0|0.0   ;;  %vm654_vm0 = vmmov (!%p137_p10), 0   ;;  %v655_v1 = vmov (!%p137_p10), 0.0   ;;  %vm189_vm1 = vcmask (!%p137_p10), 261120   ;;  %v188_v27 = vld [vmem:[%s829_s1] sm:$0xff] (!%p137_p10) }
   0xf   : > { %140 = sbr.rel (%p137_p10) target bundleno = 318 (0x13e), region = 28  ;;  %483 = vmatprep.subr.bf16.mxu0 (!%p137_p10), %v653_v0  ;;  %480 = vmatprep.mubr.msk.f32.mxu0 (!%p137_p10), %vm654_vm0, %v655_v1  ;;  %vm738_vm2 = vmpackc.low (!%p137_p10), %vm189_vm1, %vm189_vm1  ;;  %s159_s30 = sand.u32 (!%p137_p10), 1, %s635_s10  }
  0x10   : > { %s406_s3 = sshll.u32 (!%p137_p10), %s159_s30, 3  ;;  %s427_s6 = sshll.u32 (!%p137_p10), %s643_s12, 7 }
  0x11   : > { %s161_s4 = scalar_lea.vmem (!%p137_p10), [#allocation2], %s406_s3  ;;  %s783_s15 = scalar_lea.hbm (!%p137_p10), %s830_s2, %s427_s6 }
  0x12   : > { %s327_s5 = sshll.u32 (!%p137_p10), %s161_s4, 4  ;;  %s313_s16 = scalar_lea.sflag (!%p137_p10), [#allocation3], %s159_s30  ;;  %s778_s5 = int_to_ptr.vmem [resolvable:$true] %s327_s5 }
  0x13   : > { %s573_s18 = scalar_lea.vmem (!%p137_p10), %s778_s5, 128 }
  0x14   : > { %p574_p12 = scmp.ne.s32.totalorder (!%p137_p10), %s778_s5, %s573_s18 }
  0x16   : > { %s164_s23 = scalar_select %p163_p11, %s643_s12, 1 }
  0x17   : > { %p575_p13 = pnand %p574_p12, %p712_p4  ;;  %s656_s12 = smov [#allocation2]  }
  0x18   : > { %s430_s24 = sshll.u32 %s164_s23, 7  ;;  %s577_s20 = sshll.u32 %s656_s12, 4  ;;  %s578_s20 = int_to_ptr.vmem [resolvable:$false] %s577_s20 }
  0x19   : > { %s732_s27 = scalar_lea.vmem %s828_s0, %s430_s24  ;;  %p576_p0 = pneg %p575_p13 }
  0x1a   : > { %v172_v2 = vld [vmem:[%s732_s27] sm:$0xff]  ;;  %v173_v3 = vld [vmem:[%s732_s27 + $0x8] sm:$0xff]  ;;  %v174_v6 = vld [vmem:[%s732_s27 + $0x10] sm:$0xff]  ;;  %s579_s23 = scalar_lea.vmem %s578_s20, 256  ;;  %p580_p1 = scmp.lt.s32.totalorder %s778_s5, %s578_s20 }
  0x1b   : > { %v484_v5 = vpack.c.bf16 %v173_v3, %v172_v2  ;;  %v175_v7 = vld [vmem:[%s732_s27 + $0x18] sm:$0xff]  ;;  %v176_v9 = vld [vmem:[%s732_s27 + $0x20] sm:$0xff]  ;;  %v177_v10 = vld [vmem:[%s732_s27 + $0x28] sm:$0xff]  ;;  %p581_p2 = scmp.lt.s32.totalorder %s579_s23, %s573_s18 }
  0x1c   : > { %v488_v8 = vpack.c.bf16 %v175_v7, %v174_v6  ;;  %v492_v11 = vpack.c.bf16 %v177_v10, %v176_v9  ;;  %v178_v12 = vld [vmem:[%s732_s27 + $0x30] sm:$0xff]  ;;  %v179_v13 = vld [vmem:[%s732_s27 + $0x38] sm:$0xff]  ;;  %v180_v15 = vld [vmem:[%s732_s27 + $0x40] sm:$0xff] }
  0x1d   : > { %486 = vmatpush3.bf16.xpose.msk.msra.mxu0 %vm738_vm2, %v484_v5  ;;  %v496_v14 = vpack.c.bf16 %v179_v13, %v178_v12  ;;  %v181_v16 = vld [vmem:[%s732_s27 + $0x48] sm:$0xff]  ;;  %v182_v18 = vld [vmem:[%s732_s27 + $0x50] sm:$0xff]  ;;  %v183_v19 = vld [vmem:[%s732_s27 + $0x58] sm:$0xff]  ;;  %p582_p3 = por %p581_p2, %p580_p1 }
  0x1e   : > { %487 = vmatprep.subr.bf16.mxu0 %v653_v0  ;;  %v500_v17 = vpack.c.bf16 %v181_v16, %v180_v15  ;;  %v504_v20 = vpack.c.bf16 %v183_v19, %v182_v18  ;;  %v184_v21 = vld [vmem:[%s732_s27 + $0x60] sm:$0xff]  ;;  %v185_v22 = vld [vmem:[%s732_s27 + $0x68] sm:$0xff]  ;;  %v186_v24 = vld [vmem:[%s732_s27 + $0x70] sm:$0xff] }
  0x1f   : > { %v508_v23 = vpack.c.bf16 %v185_v22, %v184_v21  ;;  %v187_v25 = vld [vmem:[%s732_s27 + $0x78] sm:$0xff]  ;;  %p583_p5 = pnand %p582_p3, %p576_p0 }
  0x20   : > { %v512_v26 = vpack.c.bf16 %v187_v25, %v186_v24 }
  0x25   : > { %490 = vmatpush3.bf16.xpose.msk.msra.mxu0 %vm738_vm2, %v488_v8 }
  0x26   : > { %491 = vmatprep.subr.bf16.mxu0 %v653_v0 }
  0x2d   : > { %494 = vmatpush3.bf16.xpose.msk.msra.mxu0 %vm738_vm2, %v492_v11 }
  0x2e   : > { %495 = vmatprep.subr.bf16.mxu0 %v653_v0 }
  0x35   : > { %498 = vmatpush3.bf16.xpose.msk.msra.mxu0 %vm738_vm2, %v496_v14 }
  0x36   : > { %499 = vmatprep.subr.bf16.mxu0 %v653_v0 }
  0x3d   : > { %502 = vmatpush3.bf16.xpose.msk.msra.mxu0 %vm738_vm2, %v500_v17 }
  0x3e   : > { %503 = vmatprep.subr.bf16.mxu0 %v653_v0 }
  0x45   : > { %506 = vmatpush3.bf16.xpose.msk.msra.mxu0 %vm738_vm2, %v504_v20 }
  0x46   : > { %507 = vmatprep.subr.bf16.mxu0 %v653_v0 }
  0x4d   : > { %510 = vmatpush3.bf16.xpose.msk.msra.mxu0 %vm738_vm2, %v508_v23 }
  0x4e   : > { %511 = vmatprep.subr.bf16.mxu0 %v653_v0 }
  0x55   : > { %514 = vmatpush3.bf16.xpose.msk.msra.mxu0 %vm738_vm2, %v512_v26 }
  0x5c   : > { %481 = vmatmul.mubr.msk.f32.vlgmr.msra.gmra.mrb[0].mxu0 %vm189_vm1, %v188_v27 }
 0x12f   : > { %v307_v28 = vpop.f32.mrb[0].mxu0 }
 0x130   : > { %311 = vst [vmem:[%s161_s4] sm:$0xff] %v307_v28  ;;  %v482_v29 = vpop.f32.mrb[1].mxu0 }
 0x131   : > { %586 = shalt.err (!%p583_p5)
}
 0x132   : > { %s587_s24 = scalar_lea.hbm %s783_s15, 128  ;;  %s591_s27 = scalar_lea.hbm %s830_s2, 256 }
 0x133   : > { %p588_p6 = scmp.ne.s32.totalorder %s783_s15, %s587_s24  ;;  %p592_p10 = scmp.lt.u32.totalorder %s783_s15, %s830_s2 }
 0x134   : > { %p593_p11 = scmp.lt.u32.totalorder %s591_s27, %s587_s24  ;;  %p595_p13 = scmp.lt.u32.totalorder %s587_s24, %s783_s15 }
 0x135   : > { %p589_p7 = pnand %p588_p6, %p712_p4 }
 0x136   : > { %p594_p12 = por %p593_p11, %p592_p10 }
 0x137   : > { %p590_p9 = pneg %p589_p7 }
 0x138   : > { %p596_p0 = por %p595_p13, %p594_p12 }
 0x13a   : > { %p597_p1 = pnand %p596_p0, %p590_p9 }
 0x13c   : > { %600 = shalt.err (!%p597_p1)
}
 0x13d   : > { %515 = dma.vmem_to_hbm [thread:$0]  (%p712_p4), %s778_s5, 128, %s783_s15, %s313_s16  }
 0x13e PF: > { %p521_p2 = scmp.ge.s32.totalorder %s651_s14, 2  ;;  %s339_s30 = sand.u32 1, %s631_s9  }
 0x13f   : > { %s340_s3 = scalar_lea.sflag [#allocation3], %s339_s30 }
 0x140   : > { %p518_p3 = pnand %p521_p2, %p719_p8 }
 0x142   : > { %626 = dma.done.wait (!%p518_p3), %s340_s3, 128  }
 0x143   : > { %628 = vsyncadd (!%p518_p3), %s340_s3, 4294967168  ;;  %s15_s14 = sadd.s32 1, %s651_s14   ;;  %s835_s9 = smov %s635_s10 }
 0x144   : > { %p12_p5 = scmp.ge.s32.totalorder %s15_s14, 4   ;;  %s836_s10 = smov %s639_s11 }
 0x145   : > { %s837_s11 = smov %s725_s22  ;;  %s838_s12 = smov %s647_s13 }
 0x146   : > { %s839_s13 = smov %s841_s17  ;;  %14 = sbr.rel (!%p12_p5) target bundleno = 4 (0x4), region = 63 }
 0x14d   :  { %345 = vsyncpa [#allocation3], 1 }
 0x14e   :  { %347 = vsyncpa [#allocation3 + $0x1], 1 }

</bundles_post_ra>
